<compile_context>
chip_gen: v5e
topology: v5e:2x2
jax: 0.10.0
libtpu: 0.0.40
codegen_flags: <defaults>
</compile_context>

<pallas_src>
import functools

import jax
import jax.numpy as jnp
from jax.experimental import pallas as pl
from jax.experimental.pallas import tpu as pltpu

_LANES = 128
_SUBLANES = 8


def _per_elem_loss(d, loss_type):
    if loss_type == "l1":
        return jnp.abs(d)
    if loss_type == "l2":
        return d * d
    if loss_type == "huber":
        # F.smooth_l1_loss with default beta=1.0
        ad = jnp.abs(d)
        return jnp.where(ad < 1.0, 0.5 * d * d, ad - 0.5)
    raise NotImplementedError(loss_type)


def _loss_sum_kernel(a_ref, b_ref, out_ref, *, loss_type, tile_rows, total_rows,
                     nb_per_part, need_mask):
    c = pl.program_id(0)   # TensorCore partition ("parallel")
    j = pl.program_id(1)   # streaming block index within the partition ("arbitrary")

    @pl.when(j == 0)
    def _():
        out_ref[...] = jnp.zeros_like(out_ref)

    a = a_ref[...].astype(jnp.float32)
    b = b_ref[...].astype(jnp.float32)
    per_elem = _per_elem_loss(a - b, loss_type)

    def fold(x):
        # Fold (tile_rows, 128) into (8, 128) with VPU adds only; cross-lane reduce is
        # deferred to the JAX wrapper (runs once).
        return x.reshape(tile_rows // _SUBLANES, _SUBLANES, _LANES).sum(axis=0)

    if need_mask:
        # Only the block that crosses row == total_rows (and any clamped duplicate
        # block) pays for the iota/compare/select; all other steps take the fast path.
        logical_block = c * nb_per_part + j
        block_is_ragged = (logical_block + 1) * tile_rows > total_rows

        @pl.when(jnp.logical_not(block_is_ragged))
        def _():
            out_ref[...] += fold(per_elem)

        @pl.when(block_is_ragged)
        def _():
            row = jax.lax.broadcasted_iota(jnp.int32, (tile_rows, _LANES), 0)
            valid = (logical_block * tile_rows + row) < total_rows
            out_ref[...] += fold(jnp.where(valid, per_elem, 0.0))
    else:
        out_ref[...] += fold(per_elem)


def _device_defaults():
    """(num_parts, max_tile_rows, vmem_limit_bytes) per TPU generation."""
    kind = ""
    try:
        kind = jax.devices()[0].device_kind.lower().replace(" ", "")
    except Exception:
        pass
    is_v7 = ("v7" in kind) or ("tpu7" in kind)
    is_v5e = ("v5lite" in kind) or ("v5e" in kind)
    num_parts = 2 if is_v7 else 1            # split across TCs only on v7x megacore
    if is_v5e:
        # 2 in x 2 buf x 2 MiB = 8 MiB fits the 16 MiB scoped-VMEM default.
        return num_parts, 4096, None
    # v6e / v7x (and unknown): bigger blocks, explicit VMEM limit.
    # 2 in x 2 buf x 4 MiB = 16 MiB << 48 MiB limit (physical: 128 MiB v6e, 64 MiB v7x TC).
    return num_parts, 8192, 48 * 1024 * 1024


def diffusion_loss(noise, noise_pred, loss_type="l1", max_tile_rows=None):
    """Pallas equivalent of Diffusion_Loss(loss_type).forward(noise, noise_pred)."""
    assert noise.shape == noise_pred.shape, "shapes must match (as in F.*_loss)"
    n = noise.size

    num_parts, default_tile_rows, vmem_limit = _device_defaults()
    if max_tile_rows is None:
        max_tile_rows = default_tile_rows

    a = jnp.ravel(noise)
    b = jnp.ravel(noise_pred)

    rows = n // _LANES
    n_main = rows * _LANES

    total = jnp.float32(0.0)

    if rows > 0:
        # Sublane multiple required by the input dtype packing (8 f32 / 16 bf16 / 32 i8).
        itemsize = jnp.dtype(noise.dtype).itemsize
        sub_mult = max(_SUBLANES, 32 // max(1, itemsize))

        def rup(x, m):
            return ((x + m - 1) // m) * m

        tile_rows = min(rup(max_tile_rows, sub_mult), rup(rows, sub_mult))
        nb_total = pl.cdiv(rows, tile_rows)
        nb_per_part = pl.cdiv(nb_total, num_parts)
        # Mask needed iff the covered row range overshoots the real row count.
        need_mask = (num_parts * nb_per_part * tile_rows) != rows

        if n_main == n:
            a2d = a.reshape(rows, _LANES)          # pure reshape, no HBM copy
            b2d = b.reshape(rows, _LANES)
        else:
            a2d = a[:n_main].reshape(rows, _LANES)
            b2d = b[:n_main].reshape(rows, _LANES)

        def in_index(c, j):
            blk = c * nb_per_part + j
            if num_parts * nb_per_part > nb_total:
                # Keep DMA in-bounds; the in-kernel mask zeroes the duplicated block.
                blk = jnp.minimum(blk, nb_total - 1)
            return (blk, 0)

        kernel = functools.partial(
            _loss_sum_kernel,
            loss_type=loss_type,
            tile_rows=tile_rows,
            total_rows=rows,
            nb_per_part=nb_per_part,
            need_mask=need_mask,
        )

        cp_kwargs = dict(dimension_semantics=("parallel", "arbitrary"))
        if vmem_limit is not None:
            cp_kwargs["vmem_limit_bytes"] = int(vmem_limit)

        partials = pl.pallas_call(
            kernel,
            out_shape=jax.ShapeDtypeStruct((num_parts * _SUBLANES, _LANES), jnp.float32),
            grid_spec=pltpu.PrefetchScalarGridSpec(
                num_scalar_prefetch=0,
                grid=(num_parts, nb_per_part),
                in_specs=[
                    pl.BlockSpec((tile_rows, _LANES), in_index),
                    pl.BlockSpec((tile_rows, _LANES), in_index),
                ],
                # Output block depends only on c -> resident accumulator across j.
                out_specs=pl.BlockSpec((_SUBLANES, _LANES), lambda c, j: (c, 0)),
            ),
            compiler_params=pltpu.CompilerParams(**cp_kwargs),
        )(a2d, b2d)

        total = total + jnp.sum(partials)

    if n_main < n:
        # Tiny tail (< 128 elements): plain-JAX sum, negligible cost.
        da = a[n_main:].astype(jnp.float32) - b[n_main:].astype(jnp.float32)
        total = total + jnp.sum(_per_elem_loss(da, loss_type))

    loss = (total / jnp.float32(n)).astype(jnp.float32)
    return {"loss": loss}


def _ref_loss(noise, noise_pred, loss_type):
    d = noise.astype(jnp.float32) - noise_pred.astype(jnp.float32)
    return jnp.mean(_per_elem_loss(d, loss_type))


if __name__ == "__main__":
    key = jax.random.PRNGKey(0)
    k1, k2, k3, k4 = jax.random.split(key, 4)

    # Small NCHW shapes consistent with a diffusion noise-prediction setup.
    noise = jax.random.normal(k1, (2, 4, 16, 16), dtype=jnp.float32)
    noise_pred = jax.random.normal(k2, (2, 4, 16, 16), dtype=jnp.float32)

    out = diffusion_loss(noise, noise_pred, loss_type="l1")
    loss = jax.block_until_ready(out["loss"])
    assert jnp.allclose(loss, _ref_loss(noise, noise_pred, "l1"), rtol=1e-5, atol=1e-6)

    for lt in ("l2", "huber"):
        o = diffusion_loss(noise, noise_pred, loss_type=lt)
        assert jnp.allclose(
            jax.block_until_ready(o["loss"]), _ref_loss(noise, noise_pred, lt),
            rtol=1e-5, atol=1e-6)

    # Ragged shape: exercises the in-kernel gated mask and the JAX tail path.
    x = jax.random.normal(k3, (3, 5, 7, 11), dtype=jnp.float32)
    y = jax.random.normal(k4, (3, 5, 7, 11), dtype=jnp.float32)
    for lt in ("l1", "l2", "huber"):
        o = diffusion_loss(x, y, loss_type=lt)
        assert jnp.allclose(
            jax.block_until_ready(o["loss"]), _ref_loss(x, y, lt),
            rtol=1e-5, atol=1e-6)

    # Force multiple grid steps (small tile) to exercise the resident-output
    # accumulator, the unmasked fast path, and the ragged last block together.
    for lt in ("l1", "l2", "huber"):
        o = diffusion_loss(x, y, loss_type=lt, max_tile_rows=8)
        assert jnp.allclose(
            jax.block_until_ready(o["loss"]), _ref_loss(x, y, lt),
            rtol=1e-5, atol=1e-6)

    print("KERNEL_OK")
</pallas_src>

<mosaic_0001>
module attributes {stable_mosaic.version = 11 : i64} {
  func.func @_loss_sum_kernel(%arg0: i32, %arg1: i32, %arg2: memref<16x128xf32, #tpu.memory_space<vmem>>, %arg3: memref<16x128xf32, #tpu.memory_space<vmem>>, %arg4: memref<8x128xf32, #tpu.memory_space<vmem>>) attributes {dimension_semantics = [#tpu.dimension_semantics<parallel>, #tpu.dimension_semantics<arbitrary>], iteration_bounds = array<i64: 1, 1>, scalar_prefetch = 0 : i64, scratch_operands = 0 : i64, tpu.core_type = #tpu.core_type<tc>, window_params = [{transform_indices = @transform_0, window_bounds = array<i64: 16, 128>}, {transform_indices = @transform_1, window_bounds = array<i64: 16, 128>}, {transform_indices = @transform_2, window_bounds = array<i64: 8, 128>}]} {
    %c0_i32 = arith.constant 0 : i32
    %0 = arith.cmpi eq, %arg1, %c0_i32 : i32
    %1 = arith.extui %0 : i1 to i32
    %c0_i32_0 = arith.constant 0 : i32
    %2 = arith.cmpi ne, %1, %c0_i32_0 : i32
    scf.if %2 {
      %cst_8 = arith.constant 0.000000e+00 : f32
      %12 = vector.broadcast %cst_8 : f32 to vector<8x128xf32>
      %c0_9 = arith.constant 0 : index
      %c0_10 = arith.constant 0 : index
      %13 = vector.load %arg4[%c0_9, %c0_10] : memref<8x128xf32, #tpu.memory_space<vmem>>, vector<8x128xf32>
      tpu.vector_store %arg4[%c0_9, %c0_10], %12 {strides = array<i32>} : memref<8x128xf32, #tpu.memory_space<vmem>>, vector<8x128xf32>,
    } else {
    }
    %c0 = arith.constant 0 : index
    %c0_1 = arith.constant 0 : index
    %3 = vector.load %arg2[%c0, %c0_1] : memref<16x128xf32, #tpu.memory_space<vmem>>, vector<16x128xf32>
    %c0_2 = arith.constant 0 : index
    %c0_3 = arith.constant 0 : index
    %4 = vector.load %arg3[%c0_2, %c0_3] : memref<16x128xf32, #tpu.memory_space<vmem>>, vector<16x128xf32>
    %5 = arith.subf %3, %4 : vector<16x128xf32>
    %6 = math.absf %5 : vector<16x128xf32>
    %c0_4 = arith.constant 0 : index
    %c0_5 = arith.constant 0 : index
    %7 = vector.load %arg4[%c0_4, %c0_5] : memref<8x128xf32, #tpu.memory_space<vmem>>, vector<8x128xf32>
    %8 = vector.shape_cast %6 : vector<16x128xf32> to vector<2x8x128xf32>
    %cst = arith.constant dense<0.000000e+00> : vector<8x128xf32>
    %9 = vector.multi_reduction <add>, %8, %cst [0] : vector<2x8x128xf32> to vector<8x128xf32>
    %10 = arith.addf %7, %9 : vector<8x128xf32>
    %c0_6 = arith.constant 0 : index
    %c0_7 = arith.constant 0 : index
    %11 = vector.load %arg4[%c0_6, %c0_7] : memref<8x128xf32, #tpu.memory_space<vmem>>, vector<8x128xf32>
    tpu.vector_store %arg4[%c0_6, %c0_7], %10 {strides = array<i32>} : memref<8x128xf32, #tpu.memory_space<vmem>>, vector<8x128xf32>,
    return
  }
  func.func @transform_0(%arg0: i32, %arg1: i32) -> (i32, i32) {
    %c1_i32 = arith.constant 1 : i32
    %0 = arith.muli %arg0, %c1_i32 : i32
    %1 = arith.addi %0, %arg1 : i32
    %c0_i32 = arith.constant 0 : i32
    %c0_i32_0 = arith.constant 0 : i32
    return %1, %c0_i32 : i32, i32
  }
  func.func @transform_1(%arg0: i32, %arg1: i32) -> (i32, i32) {
    %c1_i32 = arith.constant 1 : i32
    %0 = arith.muli %arg0, %c1_i32 : i32
    %1 = arith.addi %0, %arg1 : i32
    %c0_i32 = arith.constant 0 : i32
    %c0_i32_0 = arith.constant 0 : i32
    return %1, %c0_i32 : i32, i32
  }
  func.func @transform_2(%arg0: i32, %arg1: i32) -> (i32, i32) {
    %c0_i32 = arith.constant 0 : i32
    %c0_i32_0 = arith.constant 0 : i32
    return %arg0, %c0_i32 : i32, i32
  }
}

</mosaic_0001>

<bundles_post_ra>
// kernel: tpu_custom_call.1
= control target key start
LH: loop header
LB: loop body
LE: loop exit
PB: predicated region body
PF: predicated region fallthrough
CT: control target
= control target key end

     0   :  { %7 = vsyncpa [#allocation3], 0  ;;  %s204_s0 = inlined_call_operand.hbm [shape: f32[16,128], index: 0, kind: input, shape index: {}]   ;;  %s205_s1 = inlined_call_operand.hbm [shape: f32[16,128], index: 1, kind: input, shape index: {}]   ;;  %s206_s2 = inlined_call_operand.hbm [shape: f32[8,128], index: 2, kind: output, shape index: {}]  }
   0x1   :  { %8 = vsyncpa [#allocation6], 0 }
   0x2   :  { %9 = vsyncpa [#allocation4], 0  ;;  %s18_s11 = sshll.u32 %s204_s0, 4  ;;  %s175_s12 = smov [#allocation2]   ;;  %s19_s11 = int_to_ptr.hbm [resolvable:$true] %s18_s11 }
   0x3   :  { %s20_s13 = sshll.u32 %s175_s12, 4  ;;  %s35_s16 = sshll.u32 %s205_s1, 4  ;;  %s21_s13 = int_to_ptr.vmem [resolvable:$true] %s20_s13  ;;  %s36_s16 = int_to_ptr.hbm [resolvable:$true] %s35_s16 }
   0x4   :  { %s176_s17 = smov 128   ;;  %s177_s18 = smov 8  }
   0x5   :  { %26 = dma.hbm_to_vmem [thread:$0]  %s19_s11, 256, %s21_s13, [#allocation3], %s176_s17, %s176_s17, %s177_s18  }
   0x6   :  { %s178_s19 = smov [#allocation5]  }
   0x7   :  { %s37_s20 = sshll.u32 %s178_s19, 4  ;;  %s38_s20 = int_to_ptr.vmem [resolvable:$true] %s37_s20 }
   0x8   :  { %43 = dma.hbm_to_vmem [thread:$0]  %s36_s16, 256, %s38_s20, [#allocation6], %s176_s17, %s176_s17, %s177_s18  }
   0x9   :  { %169 = dma.done.wait [#allocation3], 256  }
   0xa   :  { %170 = vsyncadd [#allocation3], 4294967040 }
   0xb   :  { %171 = dma.done.wait [#allocation6], 256  }
   0xc   :  { %172 = vsyncadd [#allocation6], 4294967040  ;;  %v61_v0 = vld [vmem:[#allocation2] sm:$0xff]  ;;  %v62_v1 = vld [vmem:[#allocation2 + $0x8] sm:$0xff]  ;;  %s179_s0 = smov [#allocation7]   ;;  %s80_s23 = sshll.u32 %s206_s2, 4  ;;  %s81_s23 = int_to_ptr.hbm [resolvable:$true] %s80_s23 }
   0xd   :  { %v63_v2 = vld [vmem:[#allocation5] sm:$0xff]  ;;  %v64_v3 = vld [vmem:[#allocation5 + $0x8] sm:$0xff]  ;;  %s78_s1 = sshll.u32 %s179_s0, 4  ;;  %s79_s1 = int_to_ptr.vmem [resolvable:$true] %s78_s1 }
   0xe   :  { %v65_v4 = vsub.f32 %v61_v0, %v63_v2  ;;  %v66_v5 = vsub.f32 %v62_v1, %v64_v3 }
  0x10   :  { %v67_v6 = vand.u32 2147483647, %v65_v4  ;;  %v68_v7 = vand.u32 2147483647, %v66_v5 }
  0x12   :  { %v70_v8 = vadd.f32 %v68_v7, %v67_v6 }
  0x14   :  { %72 = vst [vmem:[#allocation7] sm:$0xff] %v70_v8 }
  0x15   :  { %83 = dma.vmem_to_hbm [thread:$0]  %s79_s1, 128, %s81_s23, [#allocation4]  }
  0x16   :  { %173 = dma.done.wait [#allocation4], 128  }
  0x17   :  { %174 = vsyncadd [#allocation4], 4294967168 }
  0x18   :  { %88 = vsyncpa [#allocation3], 1 }
  0x19   :  { %89 = vsyncpa [#allocation6], 1 }
  0x1a   :  { %90 = vsyncpa [#allocation4], 1 }

</bundles_post_ra>
